<compile_context>
chip_gen: v5e
topology: v5e:2x2
jax: 0.10.0
libtpu: 0.0.40
codegen_flags: <defaults>
</compile_context>

<pallas_src>
import jax
import jax.numpy as jnp
import numpy as np
from jax.experimental import pallas as pl
from jax.experimental.pallas import tpu as pltpu

_MIB = 1024 * 1024


# ----------------------------------------------------------------------------
# Budget / tiling helpers
# ----------------------------------------------------------------------------
def _vmem_budget_bytes():
    """Generation-aware VMEM budget used for tile sizing (headroom below physical).

    64 MiB/TC parts (v7x-class): cap at 48 MiB so Mosaic internal scratch,
    semaphores and metadata still fit.  128 MiB parts (v5e/v6e): allow ~100 MiB.
    """
    phys = 128 * _MIB
    try:
        phys = int(pltpu.get_tpu_info().vmem_capacity_bytes)
    except Exception:  # no TPU visible at trace time / older API — assume 128 MiB
        pass
    if phys <= 64 * _MIB:
        return max(16 * _MIB, min(48 * _MIB, phys - 8 * _MIB))
    return min(100 * _MIB, phys - 24 * _MIB)


def _vmem_limit(need_bytes, budget):
    """Per-call vmem_limit_bytes: actual working set + margin, clamped to budget."""
    return int(min(max(need_bytes * 5 // 4 + 4 * _MIB, 32 * _MIB), budget))


def _desc_tiles(full, align, cap):
    """Candidate tile sizes for one dim, largest first: the full extent (always a
    legal block shape), then descending `align`-multiples down to `align`."""
    cands = [full]
    t = min(cap, (full // align) * align)
    while t >= align:
        if t < full and t not in cands:
            cands.append(t)
        t = ((t // 2) // align) * align
    return cands


def _shared_plan(M, H, D, xb, wb, ob, bb, usable):
    """Pick (tm, tn, tk) for the flattened (M,H) x (H,D) matmul.

    Preference: tm as large as possible (ideally the whole M, so the weight — the
    dominant HBM stream — and x are each fetched exactly once), then a full-H block
    (no reduction axis / accumulator), then the largest lane-dense tn that fits.
    """
    tm_c = _desc_tiles(M, 8, 8192)
    tk_c = _desc_tiles(H, 128, 8192)
    tn_c = _desc_tiles(D, 128, 2048)

    def need(tm, tn, tk):
        n = 2 * (tm * tk * xb + tn * tk * wb + tm * tn * ob + tn * bb)
        if tk < H:
            n += tm * tn * 4  # f32 accumulator scratch (single-buffered)
        return n

    for tm in tm_c:
        for tk in tk_c:
            for tn in tn_c:
                if need(tm, tn, tk) <= usable:
                    return tm, tn, tk
    # TODO(synk): if even the smallest tiles overflow the budget (extreme H), tile
    # M/H further or lower the streamed weight dtype; fall back to smallest tiles.
    return tm_c[-1], tn_c[-1], tk_c[-1]


# ----------------------------------------------------------------------------
# Kernels
# ----------------------------------------------------------------------------
def _make_shared_kernel(rhs_contract, k_tiled):
    # rhs_contract=1: weight tile is (tn, tk)  (nn.Linear layout, x @ W.T)
    # rhs_contract=0: weight tile is (tk, tn)  (pre-transposed, natural K,N RHS)
    dn = (((1,), (rhs_contract,)), ((), ()))

    if not k_tiled:
        def kernel(x_ref, w_ref, b_ref, o_ref):
            acc = jax.lax.dot_general(x_ref[...], w_ref[...], dimension_numbers=dn,
                                      preferred_element_type=jnp.float32)
            o_ref[...] = (acc + b_ref[...].astype(jnp.float32)).astype(o_ref.dtype)
        return kernel

    def kernel(x_ref, w_ref, b_ref, o_ref, acc_ref):
        k = pl.program_id(2)

        @pl.when(k == 0)
        def _():
            acc_ref[...] = jnp.zeros_like(acc_ref)

        acc_ref[...] += jax.lax.dot_general(x_ref[...], w_ref[...],
                                            dimension_numbers=dn,
                                            preferred_element_type=jnp.float32)

        @pl.when(k == pl.num_programs(2) - 1)
        def _():
            o_ref[...] = (acc_ref[...]
                          + b_ref[...].astype(jnp.float32)).astype(o_ref.dtype)

    return kernel


def _make_full_kernel(rhs_contract):
    dn = (((1,), (rhs_contract,)), ((), ()))

    def kernel(x_ref, w_ref, b_ref, o_ref):
        # x_ref: (1,B,H); w_ref: (1,tn,H) or (1,H,tn); b_ref: (1,1,tn); o_ref: (1,B,tn)
        acc = jax.lax.dot_general(x_ref[0], w_ref[0], dimension_numbers=dn,
                                  preferred_element_type=jnp.float32)
        o_ref[0] = (acc + b_ref[0].astype(jnp.float32)).astype(o_ref.dtype)

    return kernel


# ----------------------------------------------------------------------------
# Wrappers (pallas_call plumbing)
# ----------------------------------------------------------------------------
def _project_shared(x, weight, bias, *, out_in=True, _usable_override=None):
    """x: (B,N,H) -> (B*N, D).

    weight: (D,H) nn.Linear layout (out_in=True) or (H,D) pre-transposed.
    bias: (D,).
    """
    B, N, H = x.shape
    D = weight.shape[0] if out_in else weight.shape[1]
    M = B * N
    x2d = x.reshape(M, H)            # contiguous reshape, no transpose / copy
    b2d = bias.reshape(1, D)
    out_dtype = x.dtype

    xb, wb, ob = x.dtype.itemsize, weight.dtype.itemsize, out_dtype.itemsize
    bb = bias.dtype.itemsize
    budget = _vmem_budget_bytes()
    usable = int(budget * 0.85) if _usable_override is None else int(_usable_override)

    tm, tn, tk = _shared_plan(M, H, D, xb, wb, ob, bb, usable)
    d_tiles, m_tiles, k_tiles = pl.cdiv(D, tn), pl.cdiv(M, tm), pl.cdiv(H, tk)

    need = 2 * (tm * tk * xb + tn * tk * wb + tm * tn * ob + tn * bb)
    if k_tiles > 1:
        need += tm * tn * 4
    rhs_contract = 1 if out_in else 0

    if k_tiles == 1:
        # Pick the grid ordering that minimizes total HBM bytes; on ties keep the
        # D (weight) axis leading so v7x megacore shards weight traffic, not x.
        x_total, w_total = M * H * xb, D * H * wb
        d_outer = (w_total + x_total * d_tiles) <= (x_total + w_total * m_tiles)
        if d_outer:
            grid = (d_tiles, m_tiles)
            x_map = lambda d, m: (m, 0)
            w_map = (lambda d, m: (d, 0)) if out_in else (lambda d, m: (0, d))
            b_map = lambda d, m: (0, d)
            o_map = lambda d, m: (m, d)
        else:
            grid = (m_tiles, d_tiles)
            x_map = lambda m, d: (m, 0)
            w_map = (lambda m, d: (d, 0)) if out_in else (lambda m, d: (0, d))
            b_map = lambda m, d: (0, d)
            o_map = lambda m, d: (m, d)
        w_block = (tn, H) if out_in else (H, tn)
        return pl.pallas_call(
            _make_shared_kernel(rhs_contract, k_tiled=False),
            out_shape=jax.ShapeDtypeStruct((M, D), out_dtype),
            grid=grid,
            in_specs=[pl.BlockSpec((tm, H), x_map),
                      pl.BlockSpec(w_block, w_map),
                      pl.BlockSpec((1, tn), b_map)],
            out_specs=pl.BlockSpec((tm, tn), o_map),
            compiler_params=pltpu.CompilerParams(
                dimension_semantics=("parallel", "parallel"),
                vmem_limit_bytes=_vmem_limit(need, budget)),
        )(x2d, weight, b2d)

    # Large H: H-reduction grid axis with an f32 VMEM accumulator (init/finalize
    # via pl.when) so tm / tn stay traffic-optimal.
    grid = (d_tiles, m_tiles, k_tiles)
    w_block = (tn, tk) if out_in else (tk, tn)
    w_map = (lambda d, m, k: (d, k)) if out_in else (lambda d, m, k: (k, d))
    return pl.pallas_call(
        _make_shared_kernel(rhs_contract, k_tiled=True),
        out_shape=jax.ShapeDtypeStruct((M, D), out_dtype),
        grid=grid,
        in_specs=[pl.BlockSpec((tm, tk), lambda d, m, k: (m, k)),
                  pl.BlockSpec(w_block, w_map),
                  pl.BlockSpec((1, tn), lambda d, m, k: (0, d))],
        out_specs=pl.BlockSpec((tm, tn), lambda d, m, k: (m, d)),
        scratch_shapes=[pltpu.VMEM((tm, tn), jnp.float32)],
        compiler_params=pltpu.CompilerParams(
            dimension_semantics=("parallel", "parallel", "arbitrary"),
            vmem_limit_bytes=_vmem_limit(need, budget)),
    )(x2d, weight, b2d)


def _project_full(x, weight, bias, *, out_in=True):
    """x: (B,N,H); weight: (N,D,H) (out_in) or (N,H,D) pre-transposed;
    bias: (N,D) -> output (N,B,D) (token-major; folded into the final permute)."""
    B, N, H = x.shape
    D = weight.shape[1] if out_in else weight.shape[2]
    x_nbh = jnp.transpose(x, (1, 0, 2))    # (N,B,H): tiny vs. the N*D*H weight
    b3d = bias.reshape(N, 1, D)
    out_dtype = x.dtype

    xb, wb, ob = x.dtype.itemsize, weight.dtype.itemsize, out_dtype.itemsize
    bb = bias.dtype.itemsize
    budget = _vmem_budget_bytes()
    usable = int(budget * 0.85)

    # Each weight tile is used exactly once (pure weight streaming), so choose the
    # largest lane-dense tn the VMEM budget allows (default double buffering only;
    # deeper pipelining adds no overlap once tiles are multi-MiB).
    if D <= 128:
        tn = D
    else:
        denom = 2 * (H * wb + B * ob + bb)
        tn_budget = max(0, usable - 2 * B * H * xb) // max(denom, 1)
        tn = int(min(D, 2048, tn_budget))
        tn = max(128, (tn // 128) * 128)
        # TODO(synk): for extreme H where even tn=128 overflows the budget, add an
        # H-reduction axis here as in the shared path.

    grid = (N, pl.cdiv(D, tn))             # token outer, D-tile inner (x resident)
    need = 2 * (B * H * xb + tn * H * wb + B * tn * ob + tn * bb)
    w_block = (1, tn, H) if out_in else (1, H, tn)
    w_map = (lambda n, d: (n, d, 0)) if out_in else (lambda n, d: (n, 0, d))
    rhs_contract = 1 if out_in else 0

    return pl.pallas_call(
        _make_full_kernel(rhs_contract),
        out_shape=jax.ShapeDtypeStruct((N, B, D), out_dtype),
        grid=grid,
        in_specs=[
            # x block index (n,0,0) is constant over the inner d loop => resident.
            # TODO(synk): mark it pl.Buffered(1) once single-buffer pipeline_mode is
            # verified on the target JAX version (frees one B*H block of VMEM).
            pl.BlockSpec((1, B, H), lambda n, d: (n, 0, 0)),
            pl.BlockSpec(w_block, w_map),
            pl.BlockSpec((1, 1, tn), lambda n, d: (n, 0, d)),
        ],
        out_specs=pl.BlockSpec((1, B, tn), lambda n, d: (n, 0, d)),
        compiler_params=pltpu.CompilerParams(
            dimension_semantics=("parallel", "parallel"),
            vmem_limit_bytes=_vmem_limit(need, budget)),
    )(x_nbh, weight, b3d)


# ----------------------------------------------------------------------------
# Public forward
# ----------------------------------------------------------------------------
def prepare_params(weights, biases, conditioning_method):
    """Optional one-time (init-time) transpose of nn.Linear-layout weights to the
    MXU-natural (K,N) layout: (D,H)->(H,D) or (N,D,H)->(N,H,D).  Pass the result
    with weights_layout='in_out' to avoid any NT contraction inside the kernel."""
    if conditioning_method == "hidden2prefix_shared":
        return jnp.transpose(weights, (1, 0)), biases
    return jnp.transpose(weights, (0, 2, 1)), biases


def hidden2prefix_forward(
    enc_hidden_states,
    weights,
    biases,
    *,
    num_virtual_tokens,
    num_layers,
    num_kv_heads,
    embed_size_per_head,
    conditioning_method,
    weights_layout="out_in",      # "out_in" = nn.Linear (D,H)/(N,D,H); "in_out" = pre-transposed
    return_stacked=False,
):
    """Reproduces Hidden2PrefixProjection.forward.

    Returns a list of num_layers (key, value) tuples, each of shape
    (B, num_kv_heads, num_virtual_tokens, embed_size_per_head), or the single
    stacked (L, 2, B, KV, N, E) array when return_stacked=True (avoids 2*L
    per-layer slices when the caller can index it directly).
    """
    assert enc_hidden_states.shape[1] == num_virtual_tokens
    if weights_layout not in ("out_in", "in_out"):
        raise ValueError(f"unrecognized weights_layout {weights_layout}")
    out_in = weights_layout == "out_in"
    B, N, _ = enc_hidden_states.shape
    L, KV, E = num_layers, num_kv_heads, embed_size_per_head

    # TODO(synk): when E is a multiple of 128, the stacked (L,2,B,KV,N,E) layout
    # could be written directly from the kernel via a custom out index_map, saving
    # the post-kernel permute's extra HBM round trip of the full output.
    if conditioning_method == "hidden2prefix_shared":
        out = _project_shared(enc_hidden_states, weights, biases, out_in=out_in)
        out = out.reshape(B, N, L, 2, KV, E)
        stacked = jnp.transpose(out, (2, 3, 0, 4, 1, 5))                # (L,2,B,KV,N,E)
    elif conditioning_method == "hidden2prefix_full":
        out = _project_full(enc_hidden_states, weights, biases, out_in=out_in)
        out = out.reshape(N, B, L, 2, KV, E)
        stacked = jnp.transpose(out, (2, 3, 1, 4, 0, 5))                # (L,2,B,KV,N,E)
    else:
        raise ValueError(f"unrecognized conditioning method {conditioning_method}")

    if return_stacked:
        return stacked
    return [(stacked[l, 0], stacked[l, 1]) for l in range(L)]


# ----------------------------------------------------------------------------
# Demo / self-check
# ----------------------------------------------------------------------------
if __name__ == "__main__":
    # Small config consistent with the module.
    B = 2                      # batch
    N = 8                      # num_virtual_tokens
    H_ENC = 32                 # encoder hidden size
    L = 2                      # decoder num_hidden_layers
    KV = 2                     # num_key_value_heads
    E = 16                     # embed_size_per_head
    D = L * 2 * KV * E         # 128

    key = jax.random.PRNGKey(0)
    k_x, k_ws, k_bs, k_wf, k_bf, k_xk, k_wk, k_bk = jax.random.split(key, 8)

    x = jax.random.normal(k_x, (B, N, H_ENC), dtype=jnp.float32)

    # nn.Linear-shaped parameters.
    w_shared = jax.random.normal(k_ws, (D, H_ENC), dtype=jnp.float32) * 0.02
    b_shared = jax.random.normal(k_bs, (D,), dtype=jnp.float32) * 0.02
    w_full = jax.random.normal(k_wf, (N, D, H_ENC), dtype=jnp.float32) * 0.02
    b_full = jax.random.normal(k_bf, (N, D), dtype=jnp.float32) * 0.02

    # Pre-transposed ("in_out") variants, produced once at init time.
    w_shared_t, _ = prepare_params(w_shared, b_shared, "hidden2prefix_shared")
    w_full_t, _ = prepare_params(w_full, b_full, "hidden2prefix_full")

    common = dict(num_virtual_tokens=N, num_layers=L, num_kv_heads=KV,
                  embed_size_per_head=E)

    # --- shared variant, both weight layouts (f32) ---
    pkv_shared = hidden2prefix_forward(
        x, w_shared, b_shared, conditioning_method="hidden2prefix_shared", **common)
    pkv_shared_t = hidden2prefix_forward(
        x, w_shared_t, b_shared, conditioning_method="hidden2prefix_shared",
        weights_layout="in_out", **common)
    jax.block_until_ready(pkv_shared)
    jax.block_until_ready(pkv_shared_t)

    # --- full variant, both weight layouts (f32) ---
    pkv_full = hidden2prefix_forward(
        x, w_full, b_full, conditioning_method="hidden2prefix_full", **common)
    pkv_full_t = hidden2prefix_forward(
        x, w_full_t, b_full, conditioning_method="hidden2prefix_full",
        weights_layout="in_out", **common)
    jax.block_until_ready(pkv_full)
    jax.block_until_ready(pkv_full_t)

    # References (plain JAX einsum, mirrors the torch code).
    ref_shared = jnp.einsum("bnh,hd->bnd", x, w_shared.T) + b_shared
    ref_shared = jnp.transpose(ref_shared.reshape(B, N, L, 2, KV, E), (2, 3, 0, 4, 1, 5))
    ref_full = jnp.einsum("bnh,nhd->bnd", x, jnp.transpose(w_full, (0, 2, 1))) + b_full
    ref_full = jnp.transpose(ref_full.reshape(B, N, L, 2, KV, E), (2, 3, 0, 4, 1, 5))

    for l in range(L):
        for s in (0, 1):
            np.testing.assert_allclose(np.asarray(pkv_shared[l][s]),
                                       np.asarray(ref_shared[l, s]), rtol=1e-5, atol=1e-5)
            np.testing.assert_allclose(np.asarray(pkv_shared_t[l][s]),
                                       np.asarray(ref_shared[l, s]), rtol=1e-5, atol=1e-5)
            np.testing.assert_allclose(np.asarray(pkv_full[l][s]),
                                       np.asarray(ref_full[l, s]), rtol=1e-5, atol=1e-5)
            np.testing.assert_allclose(np.asarray(pkv_full_t[l][s]),
                                       np.asarray(ref_full[l, s]), rtol=1e-5, atol=1e-5)

    # --- shared variant with bf16-streamed weights/activations (f32 MXU acc) ---
    pkv_bf16 = hidden2prefix_forward(
        x.astype(jnp.bfloat16), w_shared.astype(jnp.bfloat16),
        b_shared.astype(jnp.bfloat16),
        conditioning_method="hidden2prefix_shared", **common)
    jax.block_until_ready(pkv_bf16)
    np.testing.assert_allclose(np.asarray(pkv_bf16[0][0], dtype=np.float32),
                               np.asarray(ref_shared[0, 0]), rtol=5e-2, atol=5e-2)

    # --- exercise the H-reduction (accumulator) path of the shared kernel by
    #     forcing a tiny per-call VMEM budget on a larger H ---
    H_BIG = 256
    x_k = jax.random.normal(k_xk, (B, N, H_BIG), dtype=jnp.float32)
    w_k = jax.random.normal(k_wk, (D, H_BIG), dtype=jnp.float32) * 0.02
    b_k = jax.random.normal(k_bk, (D,), dtype=jnp.float32) * 0.02
    out_k = _project_shared(x_k, w_k, b_k, out_in=True, _usable_override=200_000)
    jax.block_until_ready(out_k)
    ref_k = x_k.reshape(B * N, H_BIG) @ w_k.T + b_k
    np.testing.assert_allclose(np.asarray(out_k), np.asarray(ref_k),
                               rtol=1e-4, atol=1e-4)

    assert pkv_shared[0][0].shape == (B, KV, N, E)
    assert pkv_full[0][0].shape == (B, KV, N, E)
    print("KERNEL_OK")
</pallas_src>

<mosaic_0001>
module attributes {stable_mosaic.version = 11 : i64} {
  func.func @kernel(%arg0: i32, %arg1: i32, %arg2: memref<16x32xf32, #tpu.memory_space<vmem>>, %arg3: memref<128x32xf32, #tpu.memory_space<vmem>>, %arg4: memref<1x128xf32, #tpu.memory_space<vmem>>, %arg5: memref<16x128xf32, #tpu.memory_space<vmem>>) attributes {dimension_semantics = [#tpu.dimension_semantics<parallel>, #tpu.dimension_semantics<parallel>], iteration_bounds = array<i64: 1, 1>, scalar_prefetch = 0 : i64, scratch_operands = 0 : i64, tpu.core_type = #tpu.core_type<tc>, window_params = [{transform_indices = @transform_0, window_bounds = array<i64: 16, 32>}, {transform_indices = @transform_1, window_bounds = array<i64: 128, 32>}, {transform_indices = @transform_2, window_bounds = array<i64: 1, 128>}, {transform_indices = @transform_3, window_bounds = array<i64: 16, 128>}]} {
    %c0 = arith.constant 0 : index
    %c0_0 = arith.constant 0 : index
    %0 = vector.load %arg2[%c0, %c0_0] : memref<16x32xf32, #tpu.memory_space<vmem>>, vector<16x32xf32>
    %c0_1 = arith.constant 0 : index
    %c0_2 = arith.constant 0 : index
    %1 = vector.load %arg3[%c0_1, %c0_2] : memref<128x32xf32, #tpu.memory_space<vmem>>, vector<128x32xf32>
    %cst = arith.constant dense<0.000000e+00> : vector<16x128xf32>
    %2 = tpu.matmul %0, %1, %cst {dimension_numbers = #tpu.dot_dimension_numbers<[1], [1], [0], [0], [0, 0, 1, 0], [], []>} : vector<16x32xf32>, vector<128x32xf32>, vector<16x128xf32> -> vector<16x128xf32>
    %c0_3 = arith.constant 0 : index
    %c0_4 = arith.constant 0 : index
    %3 = vector.load %arg4[%c0_3, %c0_4] : memref<1x128xf32, #tpu.memory_space<vmem>>, vector<1x128xf32>
    %4 = vector.broadcast %3 : vector<1x128xf32> to vector<16x128xf32>
    %5 = arith.addf %2, %4 : vector<16x128xf32>
    %c0_5 = arith.constant 0 : index
    %c0_6 = arith.constant 0 : index
    %6 = vector.load %arg5[%c0_5, %c0_6] : memref<16x128xf32, #tpu.memory_space<vmem>>, vector<16x128xf32>
    tpu.vector_store %arg5[%c0_5, %c0_6], %5 {strides = array<i32>} : memref<16x128xf32, #tpu.memory_space<vmem>>, vector<16x128xf32>,
    return
  }
  func.func @transform_0(%arg0: i32, %arg1: i32) -> (i32, i32) {
    %c0_i32 = arith.constant 0 : i32
    %c0_i32_0 = arith.constant 0 : i32
    return %arg1, %c0_i32 : i32, i32
  }
  func.func @transform_1(%arg0: i32, %arg1: i32) -> (i32, i32) {
    %c0_i32 = arith.constant 0 : i32
    %c0_i32_0 = arith.constant 0 : i32
    return %arg0, %c0_i32 : i32, i32
  }
  func.func @transform_2(%arg0: i32, %arg1: i32) -> (i32, i32) {
    %c0_i32 = arith.constant 0 : i32
    %c0_i32_0 = arith.constant 0 : i32
    return %c0_i32, %arg0 : i32, i32
  }
  func.func @transform_3(%arg0: i32, %arg1: i32) -> (i32, i32) {
    %c0_i32 = arith.constant 0 : i32
    return %arg1, %arg0 : i32, i32
  }
}

</mosaic_0001>

<bundles_post_ra>
// kernel: tpu_custom_call.1
= control target key start
LH: loop header
LB: loop body
LE: loop exit
PB: predicated region body
PF: predicated region fallthrough
CT: control target
= control target key end

     0   :  { %vm37_vm0 = vcmask 261120   ;;  %s316_s0 = inlined_call_operand.vmem [shape: f32[16,32], index: 0, kind: input, shape index: {}]   ;;  %s317_s1 = inlined_call_operand.vmem [shape: f32[128,32], index: 1, kind: input, shape index: {}]   ;;  %s318_s2 = inlined_call_operand.vmem [shape: f32[1,128], index: 2, kind: input, shape index: {}]   ;;  %s319_s3 = inlined_call_operand.hbm [shape: f32[16,128], index: 3, kind: output, shape index: {}]  }
   0x1   :  { %v32_v0 = vld [vmem:[%s317_s1 + $0x78] sm:$0xff]  ;;  %v31_v1 = vld [vmem:[%s317_s1 + $0x70] sm:$0xff] }
   0x2   :  { %135 = vmatpush.xpose.msk.msra.mxu0 %vm37_vm0, %v32_v0  ;;  %153 = vmatpush.xpose.msk.msra.mxu1 %vm37_vm0, %v32_v0 }
   0x3   :  { %8 = vsyncpa [#allocation3], 0  ;;  %v30_v2 = vld [vmem:[%s317_s1 + $0x68] sm:$0xff]  ;;  %v29_v3 = vld [vmem:[%s317_s1 + $0x60] sm:$0xff]  ;;  %s123_s26 = sshll.u32 %s319_s3, 4  ;;  %s201_s27 = smov 8   ;;  %s124_s26 = int_to_ptr.hbm [resolvable:$true] %s123_s26 }
   0x4   :  { %v28_v4 = vld [vmem:[%s317_s1 + $0x58] sm:$0xff]  ;;  %v27_v5 = vld [vmem:[%s317_s1 + $0x50] sm:$0xff]  ;;  %v26_v6 = vld [vmem:[%s317_s1 + $0x48] sm:$0xff] }
   0x5   :  { %v25_v7 = vld [vmem:[%s317_s1 + $0x40] sm:$0xff]  ;;  %v24_v8 = vld [vmem:[%s317_s1 + $0x38] sm:$0xff]  ;;  %v23_v9 = vld [vmem:[%s317_s1 + $0x30] sm:$0xff] }
   0x6   :  { %136 = vmatpush.xpose.msk.msra.mxu0 %vm37_vm0, %v31_v1  ;;  %154 = vmatpush.xpose.msk.msra.mxu1 %vm37_vm0, %v31_v1  ;;  %v22_v10 = vld [vmem:[%s317_s1 + $0x28] sm:$0xff]  ;;  %v21_v11 = vld [vmem:[%s317_s1 + $0x20] sm:$0xff]  ;;  %v20_v12 = vld [vmem:[%s317_s1 + $0x18] sm:$0xff] }
   0x7   :  { %v19_v13 = vld [vmem:[%s317_s1 + $0x10] sm:$0xff]  ;;  %v18_v14 = vld [vmem:[%s317_s1 + $0x8] sm:$0xff]  ;;  %v17_v15 = vld [vmem:[%s317_s1] sm:$0xff]  ;;  %s199_s1 = smov [#allocation2]  }
   0x8   :  { %v15_v16 = vld [vmem:[%s316_s0] sm:$0xff]  ;;  %v16_v17 = vld [vmem:[%s316_s0 + $0x8] sm:$0xff]  ;;  %s121_s23 = sshll.u32 %s199_s1, 4  ;;  %s200_s0 = smov 128   ;;  %s122_s23 = int_to_ptr.vmem [resolvable:$true] %s121_s23 }
   0x9   :  { %v172_v18 = vld [vmem:[%s318_s2] ss:$0 sm:$0xff] }
   0xa   :  { %137 = vmatpush.xpose.msk.msra.mxu0 %vm37_vm0, %v30_v2  ;;  %155 = vmatpush.xpose.msk.msra.mxu1 %vm37_vm0, %v30_v2 }
   0xe   :  { %138 = vmatpush.xpose.msk.msra.mxu0 %vm37_vm0, %v29_v3  ;;  %156 = vmatpush.xpose.msk.msra.mxu1 %vm37_vm0, %v29_v3 }
  0x12   :  { %139 = vmatpush.xpose.msk.msra.mxu0 %vm37_vm0, %v28_v4  ;;  %157 = vmatpush.xpose.msk.msra.mxu1 %vm37_vm0, %v28_v4 }
  0x16   :  { %140 = vmatpush.xpose.msk.msra.mxu0 %vm37_vm0, %v27_v5  ;;  %158 = vmatpush.xpose.msk.msra.mxu1 %vm37_vm0, %v27_v5 }
  0x1a   :  { %141 = vmatpush.xpose.msk.msra.mxu0 %vm37_vm0, %v26_v6  ;;  %159 = vmatpush.xpose.msk.msra.mxu1 %vm37_vm0, %v26_v6 }
  0x1e   :  { %142 = vmatpush.xpose.msk.msra.mxu0 %vm37_vm0, %v25_v7  ;;  %160 = vmatpush.xpose.msk.msra.mxu1 %vm37_vm0, %v25_v7 }
  0x22   :  { %143 = vmatpush.xpose.msk.msra.mxu0 %vm37_vm0, %v24_v8  ;;  %161 = vmatpush.xpose.msk.msra.mxu1 %vm37_vm0, %v24_v8 }
  0x26   :  { %144 = vmatpush.xpose.msk.msra.mxu0 %vm37_vm0, %v23_v9  ;;  %162 = vmatpush.xpose.msk.msra.mxu1 %vm37_vm0, %v23_v9 }
  0x2a   :  { %145 = vmatpush.xpose.msk.msra.mxu0 %vm37_vm0, %v22_v10  ;;  %163 = vmatpush.xpose.msk.msra.mxu1 %vm37_vm0, %v22_v10 }
  0x2e   :  { %146 = vmatpush.xpose.msk.msra.mxu0 %vm37_vm0, %v21_v11  ;;  %164 = vmatpush.xpose.msk.msra.mxu1 %vm37_vm0, %v21_v11 }
  0x32   :  { %147 = vmatpush.xpose.msk.msra.mxu0 %vm37_vm0, %v20_v12  ;;  %165 = vmatpush.xpose.msk.msra.mxu1 %vm37_vm0, %v20_v12 }
  0x36   :  { %148 = vmatpush.xpose.msk.msra.mxu0 %vm37_vm0, %v19_v13  ;;  %166 = vmatpush.xpose.msk.msra.mxu1 %vm37_vm0, %v19_v13 }
  0x3a   :  { %149 = vmatpush.xpose.msk.msra.mxu0 %vm37_vm0, %v18_v14  ;;  %167 = vmatpush.xpose.msk.msra.mxu1 %vm37_vm0, %v18_v14 }
  0x3e   :  { %150 = vmatpush.xpose.msk.msra.mxu0 %vm37_vm0, %v17_v15  ;;  %168 = vmatpush.xpose.msk.msra.mxu1 %vm37_vm0, %v17_v15 }
  0x41   :  { %151 = vmatmul.msk.f32.vlgmr.msra.gmra.mxu0 %vm37_vm0, %v15_v16  ;;  %152 = vmatmul.msk.f32.vlgmr.msra.gmra.mxu1 %vm37_vm0, %v16_v17 }
  0xbe   :  { %v109_v19 = vpop.f32.mrf.mxu0  ;;  %v112_v20 = vpop.f32.mrf.mxu1 }
  0xbf   :  { %v110_v21 = vadd.f32 %v172_v18, %v109_v19  ;;  %v113_v22 = vadd.f32 %v172_v18, %v112_v20 }
  0xc1   :  { %115 = vst [vmem:[#allocation2] sm:$0xff] %v110_v21 }
  0xc2   :  { %116 = vst [vmem:[#allocation2 + $0x8] sm:$0xff] %v113_v22 }
  0xc3   :  { %129 = dma.vmem_to_hbm [thread:$0]  %s122_s23, 256, %s124_s26, [#allocation3], %s200_s0, %s200_s0, %s201_s27  }
  0xc4   :  { %197 = dma.done.wait [#allocation3], 256  }
  0xc5   :  { %198 = vsyncadd [#allocation3], 4294967040 }
  0xc6   :  { %134 = vsyncpa [#allocation3], 1 }

</bundles_post_ra>
